<compile_context>
chip_gen: v7x
topology: tpu7x:2x2x1
jax: 0.10.0
libtpu: 0.0.40
codegen_flags: <defaults>
</compile_context>

<pallas_src>
import functools

import jax
import jax.numpy as jnp
from jax.experimental import pallas as pl
from jax.experimental.pallas import tpu as pltpu


def _round_up(x, m):
    return (x + m - 1) // m * m


def _patch_embed_kernel(x_ref, w_ref, b_ref, o_ref):
    # x_ref: (TILE_M, K) bf16 patches; w_ref: (K, Dp) bf16 (VMEM-resident);
    # b_ref: (1, Dp) f32.  f32 accumulation on the MXU, f32 bias add epilogue.
    acc = jnp.dot(x_ref[...], w_ref[...], preferred_element_type=jnp.float32)
    o_ref[...] = (acc + b_ref[...]).astype(o_ref.dtype)


@functools.partial(jax.jit, static_argnames=("patch_size", "tile_m"))
def patch_embedding(x, weight, bias, *, patch_size, tile_m=512):
    """x: (B, C, H, W) NCHW.  weight: (d_model, C, p, p) (PyTorch conv layout).
    bias: (d_model,).  Returns (B, N, d_model) with N = (H//p)*(W//p)."""
    B, C, H, W = x.shape
    d_model = weight.shape[0]
    p = patch_size
    Hp, Wp = H // p, W // p
    N = Hp * Wp
    K = C * p * p
    M = B * N

    # --- glue: patchify (layout only, no compute) --------------------------
    # Cast to bf16 first so the strided NCHW -> (B*N, C*p*p) relayout moves
    # half the HBM bytes.  Crop to the conv's valid region (stride=p semantics).
    # TODO(synk): fuse this relayout into the kernel's input DMA
    # (allow_input_fusion / in-kernel patch extraction) to avoid the extra
    # HBM pass over the activation.
    xb = x[:, :, :Hp * p, :Wp * p].astype(jnp.bfloat16)
    patches = xb.reshape(B, C, Hp, p, Wp, p)
    patches = patches.transpose(0, 2, 4, 1, 3, 5).reshape(M, K)

    # conv weight (d_model, C, p, p) -> matmul weight (K, d_model), bf16.
    w_mat = weight.reshape(d_model, K).T.astype(jnp.bfloat16)
    b_mat = bias.astype(jnp.float32).reshape(1, d_model)

    # Lane-dense output: pad d_model up to a multiple of 128.
    d_pad = _round_up(d_model, 128)
    if d_pad != d_model:
        w_mat = jnp.pad(w_mat, ((0, 0), (0, d_pad - d_model)))
        b_mat = jnp.pad(b_mat, ((0, 0), (0, d_pad - d_model)))

    # Tile M; pad M up to a tile multiple (padded rows sliced off below).
    tm = min(tile_m, _round_up(M, 8))
    M_pad = _round_up(M, tm)
    if M_pad != M:
        patches = jnp.pad(patches, ((0, M_pad - M), (0, 0)))
    grid_m = M_pad // tm

    out_dtype = x.dtype
    itemsize = jnp.dtype(out_dtype).itemsize
    cost = pl.CostEstimate(
        flops=2 * M_pad * K * d_pad,
        transcendentals=0,
        bytes_accessed=(M_pad * K * 2          # bf16 patches
                        + K * d_pad * 2        # bf16 weight (read once)
                        + d_pad * 4            # f32 bias
                        + M_pad * d_pad * itemsize),  # output
    )

    out = pl.pallas_call(
        _patch_embed_kernel,
        out_shape=jax.ShapeDtypeStruct((M_pad, d_pad), out_dtype),
        grid_spec=pltpu.PrefetchScalarGridSpec(
            num_scalar_prefetch=0,
            grid=(grid_m,),
            in_specs=[
                pl.BlockSpec((tm, K), lambda i: (i, 0)),      # streamed patches
                pl.BlockSpec((K, d_pad), lambda i: (0, 0)),   # resident weight
                pl.BlockSpec((1, d_pad), lambda i: (0, 0)),   # resident bias
            ],
            out_specs=pl.BlockSpec((tm, d_pad), lambda i: (i, 0)),
        ),
        compiler_params=pltpu.CompilerParams(
            dimension_semantics=("parallel",)),
        cost_estimate=cost,
    )(patches, w_mat, b_mat)

    return out[:M, :d_model].reshape(B, N, d_model)


if __name__ == "__main__":
    # Small config consistent with the module's forward pass.
    in_channels = 4
    d_model = 32
    patch_size = 4
    B, H, W = 2, 16, 16

    key = jax.random.PRNGKey(0)
    kx, kw, kb = jax.random.split(key, 3)

    x = jax.random.normal(kx, (B, in_channels, H, W), dtype=jnp.float32)
    # Shapes match nn.Conv2d(in_channels, d_model, patch_size, stride=patch_size).
    weight = (jax.random.normal(
        kw, (d_model, in_channels, patch_size, patch_size),
        dtype=jnp.float32) * 0.02)
    bias = jax.random.normal(kb, (d_model,), dtype=jnp.float32) * 0.02

    out = patch_embedding(x, weight, bias, patch_size=patch_size)
    out = jax.block_until_ready(out)

    # Reference (pure jnp, f32): strided conv == patchify + matmul.
    p = patch_size
    Hp, Wp = H // p, W // p
    ref_patches = x.reshape(B, in_channels, Hp, p, Wp, p).transpose(
        0, 2, 4, 1, 3, 5).reshape(B, Hp * Wp, in_channels * p * p)
    ref = jnp.einsum("bnk,dk->bnd", ref_patches,
                     weight.reshape(d_model, in_channels * p * p)) + bias

    assert out.shape == (B, Hp * Wp, d_model)
    # bf16 matmul inputs with f32 accumulation -> compare with loose tolerance.
    assert jnp.allclose(out, ref, atol=1e-2, rtol=1e-2)
    print("KERNEL_OK")
</pallas_src>

<mosaic_0001>
module attributes {stable_mosaic.version = 11 : i64} {
  func.func @_patch_embed_kernel(%arg0: i32, %arg1: memref<32x64xbf16, #tpu.memory_space<vmem>>, %arg2: memref<64x128xbf16, #tpu.memory_space<vmem>>, %arg3: memref<1x128xf32, #tpu.memory_space<vmem>>, %arg4: memref<32x128xf32, #tpu.memory_space<vmem>>) attributes {dimension_semantics = [#tpu.dimension_semantics<parallel>], iteration_bounds = array<i64: 1>, scalar_prefetch = 0 : i64, scratch_operands = 0 : i64, tpu.core_type = #tpu.core_type<tc>, window_params = [{transform_indices = @transform_0, window_bounds = array<i64: 32, 64>}, {pipeline_mode = #tpu.pipeline_mode<synchronous>, transform_indices = @transform_1, window_bounds = array<i64: 64, 128>}, {pipeline_mode = #tpu.pipeline_mode<synchronous>, transform_indices = @transform_2, window_bounds = array<i64: 1, 128>}, {transform_indices = @transform_3, window_bounds = array<i64: 32, 128>}]} {
    %c0 = arith.constant 0 : index
    %c0_0 = arith.constant 0 : index
    %0 = vector.load %arg1[%c0, %c0_0] : memref<32x64xbf16, #tpu.memory_space<vmem>>, vector<32x64xbf16>
    %c0_1 = arith.constant 0 : index
    %c0_2 = arith.constant 0 : index
    %1 = vector.load %arg2[%c0_1, %c0_2] : memref<64x128xbf16, #tpu.memory_space<vmem>>, vector<64x128xbf16>
    %cst = arith.constant dense<0.000000e+00> : vector<32x128xf32>
    %2 = tpu.matmul %0, %1, %cst {dimension_numbers = #tpu.dot_dimension_numbers<[1], [0], [0], [1], [0, 0, 1, 1], [], []>} : vector<32x64xbf16>, vector<64x128xbf16>, vector<32x128xf32> -> vector<32x128xf32>
    %c0_3 = arith.constant 0 : index
    %c0_4 = arith.constant 0 : index
    %3 = vector.load %arg3[%c0_3, %c0_4] : memref<1x128xf32, #tpu.memory_space<vmem>>, vector<1x128xf32>
    %4 = vector.broadcast %3 : vector<1x128xf32> to vector<32x128xf32>
    %5 = arith.addf %2, %4 : vector<32x128xf32>
    %c0_5 = arith.constant 0 : index
    %c0_6 = arith.constant 0 : index
    %6 = vector.load %arg4[%c0_5, %c0_6] : memref<32x128xf32, #tpu.memory_space<vmem>>, vector<32x128xf32>
    tpu.vector_store %arg4[%c0_5, %c0_6], %5 {strides = array<i32>} : memref<32x128xf32, #tpu.memory_space<vmem>>, vector<32x128xf32>,
    return
  }
  func.func @transform_0(%arg0: i32) -> (i32, i32) {
    %c0_i32 = arith.constant 0 : i32
    %c0_i32_0 = arith.constant 0 : i32
    return %arg0, %c0_i32 : i32, i32
  }
  func.func @transform_1(%arg0: i32) -> (i32, i32) {
    %c0_i32 = arith.constant 0 : i32
    %c0_i32_0 = arith.constant 0 : i32
    %c0_i32_1 = arith.constant 0 : i32
    return %c0_i32, %c0_i32_0 : i32, i32
  }
  func.func @transform_2(%arg0: i32) -> (i32, i32) {
    %c0_i32 = arith.constant 0 : i32
    %c0_i32_0 = arith.constant 0 : i32
    %c0_i32_1 = arith.constant 0 : i32
    return %c0_i32, %c0_i32_0 : i32, i32
  }
  func.func @transform_3(%arg0: i32) -> (i32, i32) {
    %c0_i32 = arith.constant 0 : i32
    %c0_i32_0 = arith.constant 0 : i32
    return %arg0, %c0_i32 : i32, i32
  }
}

</mosaic_0001>

<bundles_post_ra>
// kernel: patch_embedding.1
= control target key start
LH: loop header
LB: loop body
LE: loop exit
PB: predicated region body
PF: predicated region fallthrough
CT: control target
= control target key end

     0   :  { %vm69_vm0 = vcmask 523264   ;;  %s261_s0 = inlined_call_operand.vmem [shape: bf16[32,64], index: 0, kind: input, shape index: {}]   ;;  %s262_s1 = inlined_call_operand.vmem [shape: bf16[64,128], index: 1, kind: input, shape index: {}]   ;;  %s263_s2 = inlined_call_operand.vmem [shape: f32[1,128], index: 2, kind: input, shape index: {}]   ;;  %s264_s3 = inlined_call_operand.hbm [shape: f32[32,128], index: 3, kind: output, shape index: {}]  }
   0x1   :  { %v175_v0 = vld [vmem:[%s262_s1] sm:$0xff]   ;;  %v176_v1 = vld [vmem:[%s262_s1 + $0x8] sm:$0xff]   ;;  %v177_v2 = vld [vmem:[%s262_s1 + $0x10] sm:$0xff]  }
   0x2   :  { %160 = vmatprep.subr.bf16.mxu0 %v175_v0  ;;  %v179_v3 = vld [vmem:[%s261_s0] sm:$0xff]  }
   0x3   :  { %161 = vmatpush3.bf16.msra.mxu0 %v175_v0  ;;  %168 = vmatprep.mubr.msk.bf16.mxu0 %vm69_vm0, %v179_v3 }
   0x4   :  { %162 = vmatprep.subr.bf16.mxu0 %v176_v1 }
   0x5   :  { %8 = vsyncpa [#allocation3], 0  ;;  %v178_v4 = vld [vmem:[%s262_s1 + $0x18] sm:$0xff]   ;;  %v180_v5 = vld [vmem:[%s261_s0 + $0x8] sm:$0xff]   ;;  %s205_s26 = smov [#allocation2]  }
   0x6   :  { %v145_v6 = vld [vmem:[%s263_s2] ss:$0 sm:$0xff]  ;;  %s134_s27 = sshll.u32 %s205_s26, 4  ;;  %s135_s27 = int_to_ptr.vmem [resolvable:$true] %s134_s27 }
   0x7   :  { %163 = vmatpush3.bf16.msra.mxu0 %v176_v1  ;;  %s181_s0 = scalar_lea.vmem %s135_s27, 512  ;;  %p186_p1 = scmp.lt.s32.totalorder %s135_s27, %s135_s27 }
   0x8   :  { %164 = vmatprep.subr.bf16.mxu0 %v177_v2  ;;  %p182_p0 = scmp.ne.s32.totalorder %s135_s27, %s181_s0  ;;  %p187_p2 = scmp.lt.s32.totalorder %s181_s0, %s181_s0 }
   0xa   :  { %p188_p3 = por %p187_p2, %p186_p1 }
   0xb   :  { %165 = vmatpush3.bf16.msra.mxu0 %v177_v2 }
   0xc   :  { %166 = vmatprep.subr.bf16.mxu0 %v178_v4  ;;  %p189_p4 = pnand %p188_p3, %p182_p0 }
   0xf   :  { %167 = vmatpush3.bf16.msra.mxu0 %v178_v4 }
  0x12   :  { %169 = vmatmul.mubr.msk.bf16.vlgmr.msra.gmra.mrb[0].mxu0 %vm69_vm0, %v180_v5 }
  0xe5   :  { %v170_v7 = vpop.f32.mrb[0].mxu0 }
  0xe6   :  { %v119_v8 = vadd.f32 %v170_v7, %v145_v6  ;;  %v110_v9 = vpop.f32.mrb[1].mxu0 }
  0xe7   :  { %v111_v10 = vadd.f32 %v145_v6, %v110_v9  ;;  %v171_v11 = vpop.f32.mrb[2].mxu0 }
  0xe8   :  { %127 = vst [vmem:[#allocation2 + $0x10] sm:$0xff] %v119_v8  ;;  %v122_v12 = vadd.f32 %v171_v11, %v145_v6  ;;  %v113_v13 = vpop.f32.mrb[3].mxu0 }
  0xe9   :  { %125 = vst [vmem:[#allocation2] sm:$0xff] %v111_v10  ;;  %v114_v14 = vadd.f32 %v145_v6, %v113_v13 }
  0xea   :  { %128 = vst [vmem:[#allocation2 + $0x18] sm:$0xff] %v122_v12 }
  0xeb   :  { %126 = vst [vmem:[#allocation2 + $0x8] sm:$0xff] %v114_v14 }
  0xec   :  { %192 = shalt.err (!%p189_p4)
}
  0xed   :  { %s193_s28 = scalar_lea.hbm %s264_s3, 512 }
  0xee   :  { %p194_p5 = scmp.ne.s32.totalorder %s264_s3, %s193_s28  ;;  %p197_p6 = scmp.lt.u32.totalorder %s193_s28, %s264_s3 }
  0xf0   :  { %p199_p7 = pnand %p197_p6, %p194_p5 }
  0xf2   :  { %202 = shalt.err (!%p199_p7)
}
  0xf3   :  { %s206_s6 = smov 128   ;;  %s207_s7 = smov 8  }
  0xf4   :  { %140 = dma.vmem_to_hbm [thread:$0]  %s135_s27, 512, %s264_s3, [#allocation3], %s206_s6, %s206_s6, %s207_s7  }
  0xf5   :  { %203 = dma.done.wait [#allocation3], 512  }
  0xf6   :  { %204 = vsyncadd [#allocation3], 4294966784 }
  0xf7   :  { %144 = vsyncpa [#allocation3], 1 }

</bundles_post_ra>
